<compile_context>
chip_gen: v6e
topology: v6e:2x2x1
jax: 0.10.0
libtpu: 0.0.40
codegen_flags: <defaults>
</compile_context>

<pallas_src>
import functools

import jax
import jax.numpy as jnp
from jax import lax
from jax.experimental import pallas as pl
from jax.experimental.pallas import tpu as pltpu

# Small, forward-consistent shapes for the synthetic test (original: C=384, T=256, H=64).
EMB_DIMS = 32     # C
TIMESTEPS = 8     # T
HEAD_SIZE = 16    # H
BATCH = 2         # B

LANE = 128        # TPU lane width
NEG_INF = -1e30   # large finite negative: avoids inf-inf -> NaN on fully-masked rows


def _round_up(x, m):
    return (x + m - 1) // m * m


def prepare_head_params(wq_t, wk_t, wv_t, *, head_size, compute_dtype=jnp.float32):
    """One-time parameter preparation (hoisted out of the per-call wrapper).

    * Folds head_size**-0.5 into the Wq columns (removes a (T,T) VPU multiply).
    * Zero-pads each Q/K/V segment to a 128-lane boundary so the in-kernel lane
      slices are vreg-tile aligned (no relayout copies).

    w*_t: (C, H) = nn.Linear weight transposed. Returns wqkv: (C, 3*Hp).
    """
    C, H = wq_t.shape
    assert H == head_size
    h_pad = _round_up(max(H, LANE), LANE)
    pad = h_pad - H
    scale = head_size ** -0.5
    segs = [jnp.pad(w, ((0, 0), (0, pad)))
            for w in (wq_t * scale, wk_t, wv_t)]
    return jnp.concatenate(segs, axis=1).astype(compute_dtype)   # (C, 3*Hp)


def _head_kernel(x_ref, wqkv_ref, o_ref, *, seq_len, h_pad, is_masked, approx_recip):
    """One batch element per grid step.

    x_ref:    (T, C)       input rows of this batch element
    wqkv_ref: (C, 3*Hp)    fused, lane-padded [Wq*scale | Wk | Wv]
    o_ref:    (T, Hp)      lane-dense (padded) output
    """
    mm_dtype = x_ref.dtype            # bf16 on the v6e/v7x fast path, f32 on exact path

    # Fused QKV projection: one wide MXU matmul, f32 accumulation.
    qkv = jnp.dot(x_ref[...], wqkv_ref[...],
                  preferred_element_type=jnp.float32)                 # (T, 3*Hp) f32
    # Single cast covers q, k and v (no-op on the exact f32 path).
    qkv_mm = qkv.astype(mm_dtype)

    # 128-lane-aligned slices: tile-boundary views, no relayout.
    q = qkv_mm[:, 0:h_pad]
    k = qkv_mm[:, h_pad:2 * h_pad]
    v = qkv_mm[:, 2 * h_pad:3 * h_pad]

    # q @ k^T without materializing k.T: contract last axes directly on the MXU.
    # Padded head lanes are zero in both q and k, so they contribute nothing.
    # (Scale is already folded into the Wq columns.)
    s = lax.dot_general(q, k, (((1,), (1,)), ((), ())),
                        preferred_element_type=jnp.float32)            # (T, T) f32

    if is_masked:
        row = lax.broadcasted_iota(jnp.int32, (seq_len, seq_len), 0)
        col = lax.broadcasted_iota(jnp.int32, (seq_len, seq_len), 1)
        s = jnp.where(col <= row, s, NEG_INF)

    # Numerically-stable softmax, kept strictly in f32 (v5e has no bf16 VPU/EUP).
    m = jnp.max(s, axis=-1, keepdims=True)
    p = jnp.exp(s - m)
    denom = jnp.sum(p, axis=-1, keepdims=True)

    # Dropout: identity (eval mode).
    # Flash-style normalization: PV matmul first, then scale (T, Hp) by 1/denom.
    out_b = jnp.dot(p.astype(mm_dtype), v,
                    preferred_element_type=jnp.float32)                 # (T, Hp) f32
    inv = pl.reciprocal(denom, approx=approx_recip)                     # (T, 1) f32
    o_ref[...] = (out_b * inv).astype(o_ref.dtype)


def head_forward(x, wqkv, *, head_size, is_masked,
                 compute_dtype=jnp.float32, approx_recip=False):
    """x: (B, T, C); wqkv: (C, 3*Hp) from prepare_head_params()."""
    B, T, C = x.shape
    h_pad = wqkv.shape[1] // 3
    assert h_pad % LANE == 0 and h_pad >= head_size

    # Fold batch into the row axis; per-batch (T, C) tiles are selected by the grid.
    x2d = x.reshape(B * T, C).astype(compute_dtype)

    kernel = functools.partial(
        _head_kernel, seq_len=T, h_pad=h_pad,
        is_masked=is_masked, approx_recip=approx_recip)

    out2d = pl.pallas_call(
        kernel,
        out_shape=jax.ShapeDtypeStruct((B * T, h_pad), jnp.float32),
        grid=(B,),
        in_specs=[
            pl.BlockSpec((T, C), lambda b: (b, 0)),          # per-batch rows
            pl.BlockSpec((C, 3 * h_pad), lambda b: (0, 0)),  # fused weight, shared
        ],
        out_specs=pl.BlockSpec((T, h_pad), lambda b: (b, 0)),
        compiler_params=pltpu.CompilerParams(
            dimension_semantics=("parallel",)),               # batch axis -> both TCs on v7x
    )(x2d, wqkv)

    # Drop the lane padding and restore (B, T, H).
    return out2d[:, :head_size].reshape(B, T, head_size)


def head_reference(x, wq_t, wk_t, wv_t, *, head_size, is_masked):
    q = x @ wq_t
    k = x @ wk_t
    v = x @ wv_t
    s = jnp.einsum("btd,bsd->bts", q, k) * (head_size ** -0.5)
    if is_masked:
        T = x.shape[1]
        tril = jnp.tril(jnp.ones((T, T)))
        s = jnp.where(tril == 0, -jnp.inf, s)
    p = jax.nn.softmax(s, axis=-1)
    return p @ v


if __name__ == "__main__":
    key = jax.random.PRNGKey(0)
    kx, kq, kk, kv = jax.random.split(key, 4)

    x = jax.random.normal(kx, (BATCH, TIMESTEPS, EMB_DIMS), dtype=jnp.float32)
    # nn.Linear(EMB_DIMS, head_size, bias=False) weight is (H, C); store transpose (C, H).
    wscale = EMB_DIMS ** -0.5
    wq_t = jax.random.uniform(kq, (EMB_DIMS, HEAD_SIZE), jnp.float32, -wscale, wscale)
    wk_t = jax.random.uniform(kk, (EMB_DIMS, HEAD_SIZE), jnp.float32, -wscale, wscale)
    wv_t = jax.random.uniform(kv, (EMB_DIMS, HEAD_SIZE), jnp.float32, -wscale, wscale)

    ref = head_reference(x, wq_t, wk_t, wv_t, head_size=HEAD_SIZE, is_masked=True)

    # Exact f32 path: tight tolerance.
    wqkv_f32 = prepare_head_params(wq_t, wk_t, wv_t, head_size=HEAD_SIZE,
                                   compute_dtype=jnp.float32)
    out = head_forward(x, wqkv_f32, head_size=HEAD_SIZE, is_masked=True)
    out = jax.block_until_ready(out)
    assert out.shape == (BATCH, TIMESTEPS, HEAD_SIZE)
    assert jnp.allclose(out, ref, atol=1e-5, rtol=1e-5), "f32 mismatch vs reference"

    # bf16 MXU-input fast path (v6e/v7x): f32 accumulation + f32 softmax, looser tolerance.
    wqkv_bf16 = prepare_head_params(wq_t, wk_t, wv_t, head_size=HEAD_SIZE,
                                    compute_dtype=jnp.bfloat16)
    out_bf16 = head_forward(x, wqkv_bf16, head_size=HEAD_SIZE, is_masked=True,
                            compute_dtype=jnp.bfloat16, approx_recip=True)
    out_bf16 = jax.block_until_ready(out_bf16)
    assert jnp.allclose(out_bf16, ref, atol=5e-2, rtol=5e-2), "bf16 mismatch vs reference"

    print("KERNEL_OK")
</pallas_src>

<mosaic_0001>
module attributes {stable_mosaic.version = 11 : i64} {
  func.func @_head_kernel(%arg0: i32, %arg1: memref<8x32xf32, #tpu.memory_space<vmem>>, %arg2: memref<32x384xf32, #tpu.memory_space<vmem>>, %arg3: memref<8x128xf32, #tpu.memory_space<vmem>>) attributes {dimension_semantics = [#tpu.dimension_semantics<parallel>], iteration_bounds = array<i64: 2>, scalar_prefetch = 0 : i64, scratch_operands = 0 : i64, tpu.core_type = #tpu.core_type<tc>, window_params = [{transform_indices = @transform_0, window_bounds = array<i64: 8, 32>}, {pipeline_mode = #tpu.pipeline_mode<synchronous>, transform_indices = @transform_1, window_bounds = array<i64: 32, 384>}, {transform_indices = @transform_2, window_bounds = array<i64: 8, 128>}]} {
    %c0 = arith.constant 0 : index
    %c0_0 = arith.constant 0 : index
    %0 = vector.load %arg1[%c0, %c0_0] : memref<8x32xf32, #tpu.memory_space<vmem>>, vector<8x32xf32>
    %c0_1 = arith.constant 0 : index
    %c0_2 = arith.constant 0 : index
    %1 = vector.load %arg2[%c0_1, %c0_2] : memref<32x384xf32, #tpu.memory_space<vmem>>, vector<32x384xf32>
    %cst = arith.constant dense<0.000000e+00> : vector<8x384xf32>
    %2 = tpu.matmul %0, %1, %cst {dimension_numbers = #tpu.dot_dimension_numbers<[1], [0], [0], [1], [0, 0, 1, 1], [], []>} : vector<8x32xf32>, vector<32x384xf32>, vector<8x384xf32> -> vector<8x384xf32>
    %3 = vector.extract_strided_slice %2 {offsets = [0, 0], sizes = [8, 128], strides = [1, 1]} : vector<8x384xf32> to vector<8x128xf32>
    %4 = vector.extract_strided_slice %2 {offsets = [0, 128], sizes = [8, 128], strides = [1, 1]} : vector<8x384xf32> to vector<8x128xf32>
    %5 = vector.extract_strided_slice %2 {offsets = [0, 256], sizes = [8, 128], strides = [1, 1]} : vector<8x384xf32> to vector<8x128xf32>
    %cst_3 = arith.constant dense<0.000000e+00> : vector<8x8xf32>
    %6 = tpu.matmul %3, %4, %cst_3 {dimension_numbers = #tpu.dot_dimension_numbers<[1], [1], [0], [0], [0, 0, 1, 0], [], []>} : vector<8x128xf32>, vector<8x128xf32>, vector<8x8xf32> -> vector<8x8xf32>
    %7 = tpu.iota {dimensions = array<i32: 0>} : vector<8x8xi32>
    %8 = tpu.iota {dimensions = array<i32: 1>} : vector<8x8xi32>
    %9 = arith.cmpi sle, %8, %7 : vector<8x8xi32>
    %cst_4 = arith.constant -1.000000e+30 : f32
    %10 = vector.broadcast %cst_4 : f32 to vector<8x8xf32>
    %11 = arith.select %9, %6, %10 : vector<8x8xi1>, vector<8x8xf32>
    %cst_5 = arith.constant dense<0xFF800000> : vector<8xf32>
    %12 = vector.multi_reduction <maximumf>, %11, %cst_5 [1] : vector<8x8xf32> to vector<8xf32>
    %13 = vector.shape_cast %12 : vector<8xf32> to vector<8x1xf32>
    %14 = vector.broadcast %13 : vector<8x1xf32> to vector<8x8xf32>
    %15 = arith.subf %11, %14 : vector<8x8xf32>
    %16 = math.exp %15 : vector<8x8xf32>
    %cst_6 = arith.constant dense<0.000000e+00> : vector<8xf32>
    %17 = vector.multi_reduction <add>, %16, %cst_6 [1] : vector<8x8xf32> to vector<8xf32>
    %18 = vector.shape_cast %17 : vector<8xf32> to vector<8x1xf32>
    %cst_7 = arith.constant dense<0.000000e+00> : vector<8x128xf32>
    %19 = tpu.matmul %16, %5, %cst_7 {dimension_numbers = #tpu.dot_dimension_numbers<[1], [0], [0], [1], [0, 0, 1, 1], [], []>} : vector<8x8xf32>, vector<8x128xf32>, vector<8x128xf32> -> vector<8x128xf32>
    %20 = tpu.reciprocal %18 : vector<8x1xf32> -> vector<8x1xf32>
    %21 = vector.broadcast %20 : vector<8x1xf32> to vector<8x128xf32>
    %22 = arith.mulf %19, %21 : vector<8x128xf32>
    %c0_8 = arith.constant 0 : index
    %c0_9 = arith.constant 0 : index
    %23 = vector.load %arg3[%c0_8, %c0_9] : memref<8x128xf32, #tpu.memory_space<vmem>>, vector<8x128xf32>
    tpu.vector_store %arg3[%c0_8, %c0_9], %22 {strides = array<i32>} : memref<8x128xf32, #tpu.memory_space<vmem>>, vector<8x128xf32>,
    return
  }
  func.func @transform_0(%arg0: i32) -> (i32, i32) {
    %c0_i32 = arith.constant 0 : i32
    %c0_i32_0 = arith.constant 0 : i32
    return %arg0, %c0_i32 : i32, i32
  }
  func.func @transform_1(%arg0: i32) -> (i32, i32) {
    %c0_i32 = arith.constant 0 : i32
    %c0_i32_0 = arith.constant 0 : i32
    %c0_i32_1 = arith.constant 0 : i32
    return %c0_i32, %c0_i32_0 : i32, i32
  }
  func.func @transform_2(%arg0: i32) -> (i32, i32) {
    %c0_i32 = arith.constant 0 : i32
    %c0_i32_0 = arith.constant 0 : i32
    return %arg0, %c0_i32 : i32, i32
  }
}

</mosaic_0001>

<bundles_post_ra>
// kernel: tpu_custom_call.1
= control target key start
LH: loop header
LB: loop body
LE: loop exit
PB: predicated region body
PF: predicated region fallthrough
CT: control target
= control target key end

     0   :  { %7 = vsyncpa [#allocation3], 0  ;;  %s1015_s0 = inlined_call_operand.hbm [shape: f32[16,32], index: 0, kind: input, shape index: {}]   ;;  %s1016_s1 = inlined_call_operand.hbm [shape: f32[32,384], index: 1, kind: input, shape index: {}]   ;;  %s1017_s2 = inlined_call_operand.hbm [shape: f32[16,128], index: 2, kind: output, shape index: {}]  }
   0x1   :  { %9 = vsyncpa [#allocation3 + $0x1], 0 }
   0x2   :  { %10 = vsyncpa [#allocation6], 0 }
   0x3   :  { %11 = vsyncpa [#allocation4], 0 }
   0x4   :  { %13 = vsyncpa [#allocation4 + $0x1], 0  ;;  %s846_s9 = smov 0   ;;  %s848_s10 = smov 0  }
   0x5   :  { %s850_s11 = smov 0   ;;  %s852_s12 = smov 0  }
   0x6 LB: > { %s867_s13 = sadd.s32 4294967295, %s822_s12   ;;  %s588_s14 = sadd.s32 4294967294, %s822_s12   ;;  %s822_s12 = sphi %s852_s12, %s1039_s12   ;;  %s818_s11 = sphi %s850_s11, %s1038_s11   ;;  %s814_s10 = sphi %s848_s10, %s1037_s10   ;;  %s810_s9 = sphi %s846_s9, %s1036_s9  }
   0x7   : > { %p39_p0 = scmp.ne.s32.totalorder %s814_s10, %s810_s9  ;;  %p1018_p1 = scmp.eq.s32.totalorder %s867_s13, 0 }
   0x8   : > { %p90_p3 = scmp.eq.s32.totalorder %s588_s14, 1  ;;  %p589_p5 = scmp.ge.s32.totalorder %s822_s12, 1 }
   0x9   : > { %p876_p4 = por %p1018_p1, %p39_p0  ;;  %p97_p7 = scmp.lt.s32.totalorder %s822_s12, 3 }
   0xa   : > { %p881_p6 = por %p90_p3, %p39_p0  ;;  %s824_s18 = smov [#allocation5]  }
   0xb   : > { %s1022_s15 = scalar_select %p876_p4, 1, 0 }
   0xc   : > { %s1023_s16 = scalar_select %p881_p6, 1, 0 }
   0xd   : > { %p886_p8 = pnand %p589_p5, %p97_p7  ;;  %s109_s19 = sshll.u32 %s824_s18, 4  ;;  %s110_s19 = int_to_ptr.vmem [resolvable:$true] %s109_s19 }
   0xe   : > { %s900_s21 = sadd.s32 1, %s822_s12   ;;  %s26_s22 = sadd.s32 1, %s818_s11 }
   0xf   : > { %s1024_s17 = scalar_select %p886_p8, 1, 0 }
  0x10   : > { %p643_p9 = pneg %p886_p8  ;;  %s23_s23 = ssub.s32 %s822_s12, %s900_s21 }
  0x11   : > { %s711_s24 = scalar_lea.vmem %s110_s19, 1536  ;;  %p719_p5 = scmp.lt.s32.totalorder %s110_s19, %s110_s19 }
  0x12   : > { %p895_p11 = pnand %p643_p9, %p1018_p1  ;;  %p712_p13 = scmp.ne.s32.totalorder %s110_s19, %s711_s24 }
  0x13   : > { %p720_p7 = scmp.lt.s32.totalorder %s711_s24, %s711_s24 }
  0x14   : > { %p702_p12 = pneg %p895_p11 }
  0x15   : > { %p721_p10 = por %p720_p7, %p719_p5 }
  0x16   : > { %p714_p0 = pnand %p712_p13, %p702_p12 }
  0x18   : > { %p715_p3 = pneg %p714_p0 }
  0x1a   : > { %p722_p2 = pnand %p721_p10, %p715_p3 }
  0x1c   : > { %725 = shalt.err (!%p722_p2)
}
  0x1d   : > { %s825_s25 = smov 384   ;;  %s826_s26 = smov 24  }
  0x1e   : > { %646 = dma.hbm_to_vmem [thread:$0]  (!%p895_p11), %s1016_s1, 1536, %s110_s19, [#allocation6], %s825_s25, %s825_s25, %s826_s26  }
  0x1f   : > { %p24_p9 = scmp.eq.s32.totalorder %s23_s23, 0  ;;  %p33_p12 = scmp.ne.s32.totalorder %s818_s11, %s814_s10 }
  0x20   : > { %p34_p10 = scmp.eq.s32.totalorder %s822_s12, 0  ;;  %p656_p2 = scmp.lt.s32.totalorder %s822_s12, 2 }
  0x21   : > { %s917_s29 = scalar_select %p24_p9, %s818_s11, %s26_s22  }
  0x22   : > { %p35_p13 = por %p34_p10, %p33_p12  ;;  %p1026_p0 = scmp.eq.s32.totalorder %s867_s13, 1 }
  0x23   : > { %s123_s3 = sand.u32 1, %s818_s11   ;;  %s593_s4 = sshll.u32 %s822_s12, 7 }
  0x24   : > { %p921_p3 = por %p1026_p0, %p33_p12  ;;  %s592_s5 = sshll.u32 %s123_s3, 3 }
  0x25   : > { %s930_s8 = scalar_lea.hbm %s1015_s0, %s593_s4  ;;  %s127_s14 = scalar_lea.vmem [#allocation2], %s592_s5 }
  0x26   : > { %s1027_s30 = scalar_select %p921_p3, 1, 0 }
  0x27   : > { %s134_s18 = sshll.u32 %s127_s14, 4  ;;  %p932_p11 = pnand %p656_p2, %p35_p13  ;;  %s135_s18 = int_to_ptr.vmem [resolvable:$true] %s134_s18 }
  0x28   : > { %s124_s20 = scalar_lea.sflag [#allocation3], %s123_s3  ;;  %s726_s22 = scalar_lea.hbm %s930_s8, 128 }
  0x29   : > { %p727_p5 = scmp.ne.s32.totalorder %s930_s8, %s726_s22  ;;  %p728_p7 = pneg %p932_p11 }
  0x2a   : > { %s731_s25 = scalar_lea.hbm %s1015_s0, 256  ;;  %p732_p10 = scmp.lt.s32.totalorder %s930_s8, %s1015_s0 }
  0x2b   : > { %p729_p9 = pnand %p728_p7, %p727_p5  ;;  %p733_p2 = scmp.lt.s32.totalorder %s731_s25, %s726_s22 }
  0x2d   : > { %p730_p12 = pneg %p729_p9  ;;  %p734_p13 = por %p733_p2, %p732_p10 }
  0x2f   : > { %p735_p0 = pnand %p734_p13, %p730_p12 }
  0x31   : > { %738 = shalt.err (!%p735_p0)
}
  0x32   : > { %s739_s28 = scalar_lea.vmem %s135_s18, 128  ;;  %s827_s3 = smov [#allocation2]  }
  0x33   : > { %p740_p1 = scmp.ne.s32.totalorder %s135_s18, %s739_s28  ;;  %s744_s4 = sshll.u32 %s827_s3, 4  ;;  %s745_s4 = int_to_ptr.vmem [resolvable:$false] %s744_s4 }
  0x34   : > { %s746_s5 = scalar_lea.vmem %s745_s4, 256  ;;  %p747_p5 = scmp.lt.s32.totalorder %s135_s18, %s745_s4 }
  0x35   : > { %p742_p6 = pnand %p740_p1, %p728_p7  ;;  %p748_p9 = scmp.lt.s32.totalorder %s746_s5, %s739_s28 }
  0x37   : > { %p743_p3 = pneg %p742_p6  ;;  %p749_p4 = por %p748_p9, %p747_p5 }
  0x39   : > { %p750_p8 = pnand %p749_p4, %p743_p3 }
  0x3b   : > { %753 = shalt.err (!%p750_p8)
}
  0x3c   : > { %650 = dma.hbm_to_vmem [thread:$0]  (!%p932_p11), %s930_s8, 128, %s135_s18, %s124_s20  }
  0x3d   : > { %p1029_p12 = scmp.ne.s32.totalorder %s1024_s17, 0 }
  0x3e   : > { %s953_s6 = sand.u32 (!%p1029_p12), 1, %s814_s10   ;;  %p1030_p1 = scmp.ne.s32.totalorder (!%p1029_p12), %s1022_s15, 0 }
  0x3f   : > { %143 = sbr.rel (%p1029_p12) target bundleno = 839 (0x347), region = 28  ;;  %s595_s7 = sshll.u32 (!%p1029_p12), %s953_s6, 3 }
  0x40   : > { %s146_s14 = scalar_lea.sflag (!%p1029_p12), [#allocation3], %s953_s6  ;;  %s149_s22 = scalar_lea.vmem (!%p1029_p12), [#allocation2], %s595_s7 }
  0x44   : > { %797 = dma.done.wait (%p1030_p1), %s146_s14, 128  }
  0x45   : > { %799 = vsyncadd (%p1030_p1), %s146_s14, 4294967168  ;;  %p1031_p4 = scmp.eq.s32.totalorder %s867_s13, 0 }
  0x47   : > { %801 = dma.done.wait (%p1031_p4), [#allocation6], 1536   ;;  %p1032_p6 = pmov %p1031_p4 }
  0x48   : > { %v828_v0 = vmov 0.0   ;;  %v185_v1 = vld [vmem:[#allocation5 + $0x50] sm:$0xff]  ;;  %v184_v2 = vld [vmem:[#allocation5 + $0x48] sm:$0xff]  ;;  %v182_v3 = vld [vmem:[#allocation5 + $0x38] sm:$0xff]  ;;  %vm187_vm0 = vcmask 261120   ;;  %vm829_vm1 = vmmov 0   ;;  %v402_v16 = vlaneseq }
  0x49   : > { %803 = vsyncadd (%p1032_p6), [#allocation6], 4294965760  ;;  %255 = vmatprep.mubr.f32.mxu0 %v828_v0  ;;  %614 = vmatprep.subr.mxu1 %v828_v0  ;;  %v181_v4 = vld [vmem:[#allocation5 + $0x30] sm:$0xff]  ;;  %v179_v5 = vld [vmem:[#allocation5 + $0x20] sm:$0xff]  ;;  %vm408_vm3 = vcmask 64512   ;;  %s602_s15 = sshll.u32 %s867_s13, 7 }
  0x4a   : > { %215 = vmatprep.subr.mxu0 %v185_v1  ;;  %v178_v6 = vld [vmem:[#allocation5 + $0x18] sm:$0xff]  ;;  %v176_v7 = vld [vmem:[#allocation5 + $0x8] sm:$0xff]  ;;  %v175_v8 = vld [vmem:[#allocation5] sm:$0xff]  ;;  %622 = vmatprep.mubr.msk.f32.mxu1 %vm829_vm1, %v828_v0  ;;  %v403_v17 = vshrl.u32 %v402_v16, 7  ;;  %v405_v18 = vand.u32 127, %v402_v16  ;;  %s173_s17 = scalar_lea.vmem [#allocation7], %s595_s7  ;;  %s978_s20 = scalar_lea.hbm %s1017_s2, %s602_s15 }
  0x4b   : > { %216 = vmatpush1.msra.mxu0 %v184_v2  ;;  %v174_v9 = vld [vmem:[%s149_s22] sm:$0xff]  ;;  %v183_v11 = vld [vmem:[#allocation5 + $0x40] sm:$0xff]  ;;  %v180_v12 = vld [vmem:[#allocation5 + $0x28] sm:$0xff]  ;;  %s508_s8 = sshll.u32 %s173_s17, 4  ;;  %s495_s23 = scalar_lea.sflag [#allocation4], %s953_s6  ;;  %s509_s8 = int_to_ptr.vmem [resolvable:$true] %s508_s8 }
  0x4c   : > { %217 = vmatprep.subr.mxu0 %v182_v3  ;;  %v186_v10 = vld [vmem:[#allocation5 + $0x58] sm:$0xff]  ;;  %v177_v13 = vld [vmem:[#allocation5 + $0x10] sm:$0xff]  ;;  %vm406_vm2 = vcmp.le.s32.totalorder %v405_v18, %v403_v17  ;;  %s754_s24 = scalar_lea.vmem %s509_s8, 128  ;;  %p1033_p3 = scmp.ne.s32.totalorder %s1027_s30, 0 }
  0x4d   : > { %218 = vmatpush1.msra.mxu0 %v181_v4  ;;  %615 = vmatpush3.msra.mxu1 %v186_v10  ;;  %p755_p8 = scmp.ne.s32.totalorder %s509_s8, %s754_s24  ;;  %s830_s13 = smov [#allocation7]  }
  0x4e   : > { %219 = vmatprep.subr.mxu0 %v179_v5  ;;  %616 = vmatprep.subr.mxu1 %v828_v0  ;;  %s758_s25 = sshll.u32 %s830_s13, 4  ;;  %s759_s25 = int_to_ptr.vmem [resolvable:$false] %s758_s25 }
  0x4f   : > { %220 = vmatpush1.msra.mxu0 %v178_v6  ;;  %617 = vmatpush3.msra.mxu1 %v183_v11  ;;  %p756_p11 = pnand %p755_p8, %p1033_p3  ;;  %s760_s26 = scalar_lea.vmem %s759_s25, 256 }
  0x50   : > { %221 = vmatprep.subr.mxu0 %v176_v7  ;;  %618 = vmatprep.subr.mxu1 %v828_v0  ;;  %p761_p10 = scmp.lt.s32.totalorder %s509_s8, %s759_s25  ;;  %p762_p2 = scmp.lt.s32.totalorder %s760_s26, %s754_s24 }
  0x51   : > { %222 = vmatpush1.msra.mxu0 %v175_v8  ;;  %619 = vmatpush3.msra.mxu1 %v180_v12  ;;  %p757_p7 = pneg %p756_p11 }
  0x52   : > { %598 = vmatmul.mubr.msk.f32.vlgmr.msra.gmra.mxu0 %vm187_vm0, %v174_v9  ;;  %625 = vmatprep.subr.mxu0 %v828_v0  ;;  %p763_p13 = por %p762_p2, %p761_p10 }
  0x53   : > { %627 = vmatprep.mubr.msk.f32.mxu0 %vm829_vm1, %v828_v0  ;;  %620 = vmatprep.subr.mxu1 %v828_v0 }
  0x54   : > { %621 = vmatpush3.msra.mxu1 %v177_v13  ;;  %p764_p0 = pnand %p763_p13, %p757_p7 }
  0x55   : > { %623 = vmatmul.mubr.msk.f32.vlgmr.msra.gmra.mxu1 %vm187_vm0, %v174_v9  ;;  %630 = vmatprep.subr.mxu1 %v828_v0 }
  0x56   : > { %632 = vmatprep.mubr.msk.f32.mxu1 %vm829_vm1, %v828_v0 }
 0x112   : > { %v257_v14 = vpop.f32.mrf.mxu0 }
 0x114   : > { %v259_v15 = vpop.f32.mrf.mxu0 }
 0x115   : > { %626 = vmatpush3.xpose.msra.mxu0 %v259_v15  ;;  %v328_v23 = vpop.f32.mrf.mxu1 }
 0x116   : > { %631 = vmatpush3.msra.mxu1 %v328_v23 }
 0x117   : > { %v624_v24 = vpop.f32.mrf.mxu1 }
 0x118   : > { %628 = vmatmul.mubr.f32.vlgmr.msra.gmra.mxu0 %v257_v14 }
 0x1d8   : > { %v398_v19 = vpop.f32.mrf.mxu0 }
 0x1d9   : > { %v407_v20 = vsel %vm406_vm2, %v398_v19, -1e+30 }
 0x1da   : > { %v629_v21 = vpop.f32.mrf.mxu0  ;;  %v409_v22 = vsel %vm408_vm3, %v407_v20, -inf }
 0x1db   : > { %410 = vmax.xlane.f32.xlu0 %v409_v22 }
 0x264   : > { %v411_v25 = vpop.xlane.xlu0 %410 }
 0x265   : > { %v412_v26 = vsub.f32 %v407_v20, %v411_v25 }
 0x267   : > { %v413_v27 = vmul.f32 1.442695, %v412_v26 }
 0x269   : > { %696 = vpow2.f32 %v413_v27 }
 0x276   : > { %v697_v28 = vpop.eup %696 }
 0x277   : > { %633 = vmatmul.mubr.msk.f32.vlgmr.msra.gmra.mxu1 %vm408_vm3, %v697_v28  ;;  %v415_v29 = vsel %vm408_vm3, %v697_v28, 0.0 }
 0x278   : > { %416 = vadd.xlane.f32.xlu0 %v415_v29 }
 0x301   : > { %v417_v30 = vpop.xlane.xlu0 %416 }
 0x302   : > { %698 = vrcp.f32 %v417_v30 }
 0x30f   : > { %v699_v31 = vpop.eup %698 }
 0x337   : > { %v487_v32 = vpop.f32.mrf.mxu1 }
 0x338   : > { %v492_v33 = vmul.f32 %v699_v31, %v487_v32 }
 0x339   : > { %v634_v34 = vpop.f32.mrf.mxu1 }
 0x33a   : > { %493 = vst [vmem:[%s173_s17] sm:$0xff] %v492_v33 }
 0x33b   : > { %767 = shalt.err (!%p764_p0)
}
 0x33c   : > { %s768_s27 = scalar_lea.hbm %s978_s20, 128  ;;  %s772_s4 = scalar_lea.hbm %s1017_s2, 256 }
 0x33d   : > { %p769_p5 = scmp.ne.s32.totalorder %s978_s20, %s768_s27  ;;  %p773_p1 = scmp.lt.s32.totalorder %s978_s20, %s1017_s2 }
 0x33e   : > { %p774_p4 = scmp.lt.s32.totalorder %s772_s4, %s768_s27 }
 0x33f   : > { %p770_p9 = pnand %p769_p5, %p1033_p3 }
 0x340   : > { %p775_p6 = por %p774_p4, %p773_p1 }
 0x341   : > { %p771_p12 = pneg %p770_p9 }
 0x343   : > { %p776_p8 = pnand %p775_p6, %p771_p12 }
 0x345   : > { %779 = shalt.err (!%p776_p8)
}
 0x346   : > { %641 = dma.vmem_to_hbm [thread:$0]  (%p1033_p3), %s509_s8, 128, %s978_s20, %s495_s23  }
 0x347 PF: > { %s520_s7 = sand.u32 1, %s810_s9   ;;  %p1034_p11 = scmp.ne.s32.totalorder %s1023_s16, 0 }
 0x348   : > { %p1035_p7 = scmp.ge.s32.totalorder %s822_s12, 2  ;;  %s521_s14 = scalar_lea.sflag [#allocation4], %s520_s7 }
 0x34a   : > { %p652_p10 = pnand %p1035_p7, %p1034_p11 }
 0x34c   : > { %p653_p2 = pneg %p652_p10 }
 0x34e   : > { %805 = dma.done.wait (%p653_p2), %s521_s14, 128  }
 0x34f   : > { %807 = vsyncadd (%p653_p2), %s521_s14, 4294967168  ;;  %p16_p13 = scmp.ge.s32.totalorder %s900_s21, 4   ;;  %s1036_s9 = smov %s814_s10 }
 0x350   : > { %s1037_s10 = smov %s818_s11  ;;  %s1038_s11 = smov %s917_s29 }
 0x351   : > { %s1039_s12 = smov %s900_s21  ;;  %18 = sbr.rel (!%p16_p13) target bundleno = 6 (0x6), region = 77 }
 0x356   :  { %526 = vsyncpa [#allocation3], 1 }
 0x357   :  { %528 = vsyncpa [#allocation3 + $0x1], 1 }
 0x358   :  { %529 = vsyncpa [#allocation6], 1 }
 0x359   :  { %530 = vsyncpa [#allocation4], 1 }
 0x35a   :  { %532 = vsyncpa [#allocation4 + $0x1], 1 }

</bundles_post_ra>
